<compile_context>
chip_gen: v5e
topology: v5e:2x2
jax: 0.10.0
libtpu: 0.0.40
codegen_flags: <defaults>
</compile_context>

<pallas_src>
import functools
import math

import jax
import jax.numpy as jnp
from jax.experimental import pallas as pl
from jax.experimental.pallas import tpu as pltpu

# ---- model config (small, consistent with the module) ----
CFG = dict(emb_dim=32, context_length=8, n_heads=4, drop_rate=0.0, qkv_bias=False)
EXPANSION = 4
EPS = 1e-5
NEG_BIG = -1e30  # large finite negative (safe: diagonal is always unmasked)


def _layernorm(v, gamma, beta):
    mean = jnp.mean(v, axis=-1, keepdims=True)
    var = jnp.mean((v - mean) ** 2, axis=-1, keepdims=True)  # unbiased=False
    inv = jax.lax.rsqrt(var + EPS)                            # EUP rsqrt, no divide
    return gamma * ((v - mean) * inv) + beta


def _gelu_tanh(x):
    # GELU (tanh approximation), as in the reference GELU module
    return 0.5 * x * (1.0 + jnp.tanh(jnp.sqrt(2.0 / jnp.pi) * (x + 0.044715 * x * x * x)))


def _transformer_block_kernel(
    x_ref,
    ln1_g_ref, ln1_b_ref,
    wqkv_ref, wo_ref, bo_ref,
    ln2_g_ref, ln2_b_ref,
    w1_ref, b1_ref, w2_ref, b2_ref,
    out_ref,
    *, num_heads,
):
    x = x_ref[0]                                  # (T, D) fp32, this batch element
    t, d = x.shape

    # ---- norm_1 ----
    h = _layernorm(x, ln1_g_ref[...], ln1_b_ref[...])

    # ---- fused head-batched QKV projection ----
    # wqkv_ref: (3H, D, hd); attention scale already folded into the Q slice.
    # The broadcast of h is per-batch tiny ((3H, T, D) ~ a few KiB).
    hb = jnp.broadcast_to(h[None, :, :], (3 * num_heads, t, d))
    qkv = jnp.einsum("gtd,gdc->gtc", hb, wqkv_ref[...],
                     preferred_element_type=jnp.float32)          # (3H, T, hd)
    q = qkv[:num_heads]                     # (H, T, hd) -- leading-axis split, no lane slicing
    k = qkv[num_heads:2 * num_heads]
    v = qkv[2 * num_heads:]

    # ---- causal self-attention (per batch element) ----
    s = jnp.einsum("hid,hjd->hij", q, k, preferred_element_type=jnp.float32)   # (H, T, T)
    row = jax.lax.broadcasted_iota(jnp.int32, (t, t), 0)
    col = jax.lax.broadcasted_iota(jnp.int32, (t, t), 1)
    s = jnp.where((col <= row)[None, :, :], s, NEG_BIG)           # in-kernel iota mask
    m = jnp.max(s, axis=-1, keepdims=True)
    e = jnp.exp(s - m)
    p = e / jnp.sum(e, axis=-1, keepdims=True)                    # exact softmax
    # attention-weight dropout with p = 0.0 -> identity
    ctx = jnp.einsum("hij,hjd->hid", p, v, preferred_element_type=jnp.float32)  # (H, T, hd)

    # ---- output projection; head-merge fused into an accumulating per-head matmul ----
    attn_out = jnp.dot(ctx[0], wo_ref[0], preferred_element_type=jnp.float32)
    for hh in range(1, num_heads):
        attn_out = attn_out + jnp.dot(ctx[hh], wo_ref[hh],
                                      preferred_element_type=jnp.float32)
    attn_out = attn_out + bo_ref[...]

    # drop_shortcut (p = 0.0) -> identity; first residual
    x1 = x + attn_out

    # ---- norm_2 + feed-forward (hidden = 4*D = 128 lanes, lane-dense) ----
    h2 = _layernorm(x1, ln2_g_ref[...], ln2_b_ref[...])
    ff1 = jnp.dot(h2, w1_ref[...], preferred_element_type=jnp.float32) + b1_ref[...]
    ff2 = jnp.dot(_gelu_tanh(ff1), w2_ref[...], preferred_element_type=jnp.float32) + b2_ref[...]

    out_ref[0] = x1 + ff2


def transformer_block(x, params, num_heads):
    B, T, D = x.shape
    hd = D // num_heads
    Hff = params["w1"].shape[1]

    # ---- weight prep (outside the kernel, cheap trace-time XLA ops) ----
    def per_head(w):   # (D, D) -> (H, D, hd); head h uses output columns h*hd:(h+1)*hd
        return w.reshape(D, num_heads, hd).transpose(1, 0, 2)

    # Fold 1/sqrt(head_dim) into the Q weights; fuse Q/K/V along the leading head axis.
    wqkv = jnp.concatenate(
        [per_head(params["wq"] * (1.0 / math.sqrt(hd))),
         per_head(params["wk"]),
         per_head(params["wv"])], axis=0)                 # (3H, D, hd)
    wo_h = params["wo"].reshape(num_heads, hd, D)          # (H, hd, D)

    kernel = functools.partial(_transformer_block_kernel, num_heads=num_heads)

    full2 = lambda b: (0, 0)
    full3 = lambda b: (0, 0, 0)

    out = pl.pallas_call(
        kernel,
        out_shape=jax.ShapeDtypeStruct((B, T, D), jnp.float32),
        grid=(B,),
        in_specs=[
            pl.BlockSpec((1, T, D), lambda b: (b, 0, 0)),                    # x (per batch)
            pl.BlockSpec((1, D), full2), pl.BlockSpec((1, D), full2),        # ln1 gamma/beta
            pl.BlockSpec((3 * num_heads, D, hd), full3),                     # fused QKV weights
            pl.BlockSpec((num_heads, hd, D), full3),                         # out-proj weights
            pl.BlockSpec((1, D), full2),                                     # out-proj bias
            pl.BlockSpec((1, D), full2), pl.BlockSpec((1, D), full2),        # ln2 gamma/beta
            pl.BlockSpec((D, Hff), full2), pl.BlockSpec((1, Hff), full2),    # FF layer 1
            pl.BlockSpec((Hff, D), full2), pl.BlockSpec((1, D), full2),      # FF layer 2
        ],
        out_specs=pl.BlockSpec((1, T, D), lambda b: (b, 0, 0)),
        compiler_params=pltpu.CompilerParams(
            dimension_semantics=("parallel",)),  # batch axis shards across TCs on v7x
    )(
        x,
        params["ln1_g"].reshape(1, D), params["ln1_b"].reshape(1, D),
        wqkv, wo_h, params["bo"].reshape(1, D),
        params["ln2_g"].reshape(1, D), params["ln2_b"].reshape(1, D),
        params["w1"], params["b1"].reshape(1, Hff),
        params["w2"], params["b2"].reshape(1, D),
    )
    return out


def reference_block(x, p, num_heads):
    """Pure-JAX reference mirroring the PyTorch forward (drop_rate=0)."""
    B, T, D = x.shape
    hd = D // num_heads

    def ln(v, g, b):
        mean = v.mean(-1, keepdims=True)
        var = ((v - mean) ** 2).mean(-1, keepdims=True)
        return g * (v - mean) / jnp.sqrt(var + EPS) + b

    short = x
    h = ln(x, p["ln1_g"], p["ln1_b"])
    q = h @ p["wq"]; k = h @ p["wk"]; v = h @ p["wv"]
    q = q.reshape(B, T, num_heads, hd).transpose(0, 2, 1, 3)
    k = k.reshape(B, T, num_heads, hd).transpose(0, 2, 1, 3)
    v = v.reshape(B, T, num_heads, hd).transpose(0, 2, 1, 3)
    s = jnp.einsum("bhtd,bhsd->bhts", q, k) / math.sqrt(hd)
    mask = jnp.tril(jnp.ones((T, T), bool))
    s = jnp.where(mask, s, -jnp.inf)
    a = jax.nn.softmax(s, axis=-1)
    ctx = jnp.einsum("bhts,bhsd->bhtd", a, v).transpose(0, 2, 1, 3).reshape(B, T, D)
    attn = ctx @ p["wo"] + p["bo"]
    x = attn + short
    short = x
    h2 = ln(x, p["ln2_g"], p["ln2_b"])
    f = _gelu_tanh(h2 @ p["w1"] + p["b1"]) @ p["w2"] + p["b2"]
    return f + short


def init_params(key, emb_dim, expansion):
    D, H = emb_dim, expansion * emb_dim
    ks = jax.random.split(key, 8)
    std = 0.02
    return dict(
        ln1_g=jnp.ones((D,), jnp.float32),
        ln1_b=jnp.zeros((D,), jnp.float32),
        wq=jax.random.normal(ks[0], (D, D), jnp.float32) * std,
        wk=jax.random.normal(ks[1], (D, D), jnp.float32) * std,
        wv=jax.random.normal(ks[2], (D, D), jnp.float32) * std,
        wo=jax.random.normal(ks[3], (D, D), jnp.float32) * std,
        bo=jnp.zeros((D,), jnp.float32),
        ln2_g=jnp.ones((D,), jnp.float32),
        ln2_b=jnp.zeros((D,), jnp.float32),
        w1=jax.random.normal(ks[4], (D, H), jnp.float32) * std,
        b1=jnp.zeros((H,), jnp.float32),
        w2=jax.random.normal(ks[5], (H, D), jnp.float32) * std,
        b2=jnp.zeros((D,), jnp.float32),
    )


if __name__ == "__main__":
    B, T, D = 2, CFG["context_length"], CFG["emb_dim"]
    key = jax.random.PRNGKey(0)
    kx, kp = jax.random.split(key)
    x = jax.random.normal(kx, (B, T, D), jnp.float32)
    params = init_params(kp, D, EXPANSION)

    out = jax.block_until_ready(transformer_block(x, params, CFG["n_heads"]))
    ref = jax.block_until_ready(reference_block(x, params, CFG["n_heads"]))

    assert out.shape == (B, T, D)
    assert jnp.allclose(out, ref, atol=1e-3, rtol=1e-3), "mismatch vs pure-JAX reference"
    print("KERNEL_OK")
</pallas_src>

<mosaic_0001>
module attributes {stable_mosaic.version = 11 : i64} {
  func.func @_transformer_block_kernel(%arg0: i32, %arg1: memref<1x8x32xf32, #tpu.memory_space<vmem>>, %arg2: memref<1x32xf32, #tpu.memory_space<vmem>>, %arg3: memref<1x32xf32, #tpu.memory_space<vmem>>, %arg4: memref<12x32x8xf32, #tpu.memory_space<vmem>>, %arg5: memref<4x8x32xf32, #tpu.memory_space<vmem>>, %arg6: memref<1x32xf32, #tpu.memory_space<vmem>>, %arg7: memref<1x32xf32, #tpu.memory_space<vmem>>, %arg8: memref<1x32xf32, #tpu.memory_space<vmem>>, %arg9: memref<32x128xf32, #tpu.memory_space<vmem>>, %arg10: memref<1x128xf32, #tpu.memory_space<vmem>>, %arg11: memref<128x32xf32, #tpu.memory_space<vmem>>, %arg12: memref<1x32xf32, #tpu.memory_space<vmem>>, %arg13: memref<1x8x32xf32, #tpu.memory_space<vmem>>) attributes {dimension_semantics = [#tpu.dimension_semantics<parallel>], iteration_bounds = array<i64: 2>, scalar_prefetch = 0 : i64, scratch_operands = 0 : i64, tpu.core_type = #tpu.core_type<tc>, window_params = [{transform_indices = @transform_0, window_bounds = array<i64: 1, 8, 32>}, {pipeline_mode = #tpu.pipeline_mode<synchronous>, transform_indices = @transform_1, window_bounds = array<i64: 1, 32>}, {pipeline_mode = #tpu.pipeline_mode<synchronous>, transform_indices = @transform_2, window_bounds = array<i64: 1, 32>}, {pipeline_mode = #tpu.pipeline_mode<synchronous>, transform_indices = @transform_3, window_bounds = array<i64: 12, 32, 8>}, {pipeline_mode = #tpu.pipeline_mode<synchronous>, transform_indices = @transform_4, window_bounds = array<i64: 4, 8, 32>}, {pipeline_mode = #tpu.pipeline_mode<synchronous>, transform_indices = @transform_5, window_bounds = array<i64: 1, 32>}, {pipeline_mode = #tpu.pipeline_mode<synchronous>, transform_indices = @transform_6, window_bounds = array<i64: 1, 32>}, {pipeline_mode = #tpu.pipeline_mode<synchronous>, transform_indices = @transform_7, window_bounds = array<i64: 1, 32>}, {pipeline_mode = #tpu.pipeline_mode<synchronous>, transform_indices = @transform_8, window_bounds = array<i64: 32, 128>}, {pipeline_mode = #tpu.pipeline_mode<synchronous>, transform_indices = @transform_9, window_bounds = array<i64: 1, 128>}, {pipeline_mode = #tpu.pipeline_mode<synchronous>, transform_indices = @transform_10, window_bounds = array<i64: 128, 32>}, {pipeline_mode = #tpu.pipeline_mode<synchronous>, transform_indices = @transform_11, window_bounds = array<i64: 1, 32>}, {transform_indices = @transform_12, window_bounds = array<i64: 1, 8, 32>}]} {
    %c0 = arith.constant 0 : index
    %c0_0 = arith.constant 0 : index
    %c0_1 = arith.constant 0 : index
    %0 = vector.load %arg1[%c0, %c0_0, %c0_1] : memref<1x8x32xf32, #tpu.memory_space<vmem>>, vector<1x8x32xf32>
    %1 = vector.shape_cast %0 : vector<1x8x32xf32> to vector<8x32xf32>
    %c0_2 = arith.constant 0 : index
    %c0_3 = arith.constant 0 : index
    %2 = vector.load %arg2[%c0_2, %c0_3] : memref<1x32xf32, #tpu.memory_space<vmem>>, vector<1x32xf32>
    %c0_4 = arith.constant 0 : index
    %c0_5 = arith.constant 0 : index
    %3 = vector.load %arg3[%c0_4, %c0_5] : memref<1x32xf32, #tpu.memory_space<vmem>>, vector<1x32xf32>
    %cst = arith.constant dense<0.000000e+00> : vector<8xf32>
    %4 = vector.multi_reduction <add>, %1, %cst [1] : vector<8x32xf32> to vector<8xf32>
    %5 = vector.shape_cast %4 : vector<8xf32> to vector<8x1xf32>
    %cst_6 = arith.constant 3.200000e+01 : f32
    %6 = vector.broadcast %cst_6 : f32 to vector<8x1xf32>
    %7 = arith.divf %5, %6 : vector<8x1xf32>
    %8 = vector.broadcast %7 : vector<8x1xf32> to vector<8x32xf32>
    %9 = arith.subf %1, %8 : vector<8x32xf32>
    %10 = arith.mulf %9, %9 : vector<8x32xf32>
    %cst_7 = arith.constant dense<0.000000e+00> : vector<8xf32>
    %11 = vector.multi_reduction <add>, %10, %cst_7 [1] : vector<8x32xf32> to vector<8xf32>
    %12 = vector.shape_cast %11 : vector<8xf32> to vector<8x1xf32>
    %cst_8 = arith.constant 3.200000e+01 : f32
    %13 = vector.broadcast %cst_8 : f32 to vector<8x1xf32>
    %14 = arith.divf %12, %13 : vector<8x1xf32>
    %cst_9 = arith.constant 9.99999974E-6 : f32
    %15 = vector.broadcast %cst_9 : f32 to vector<8x1xf32>
    %16 = arith.addf %14, %15 : vector<8x1xf32>
    %17 = math.rsqrt %16 : vector<8x1xf32>
    %18 = vector.broadcast %7 : vector<8x1xf32> to vector<8x32xf32>
    %19 = arith.subf %1, %18 : vector<8x32xf32>
    %20 = vector.broadcast %17 : vector<8x1xf32> to vector<8x32xf32>
    %21 = arith.mulf %19, %20 : vector<8x32xf32>
    %22 = vector.broadcast %2 : vector<1x32xf32> to vector<8x32xf32>
    %23 = arith.mulf %22, %21 : vector<8x32xf32>
    %24 = vector.broadcast %3 : vector<1x32xf32> to vector<8x32xf32>
    %25 = arith.addf %23, %24 : vector<8x32xf32>
    %26 = vector.shape_cast %25 : vector<8x32xf32> to vector<1x8x32xf32>
    %27 = vector.shape_cast %26 : vector<1x8x32xf32> to vector<1x8x32xf32>
    %28 = vector.broadcast %27 : vector<1x8x32xf32> to vector<12x8x32xf32>
    %c0_10 = arith.constant 0 : index
    %c0_11 = arith.constant 0 : index
    %c0_12 = arith.constant 0 : index
    %29 = vector.load %arg4[%c0_10, %c0_11, %c0_12] : memref<12x32x8xf32, #tpu.memory_space<vmem>>, vector<12x32x8xf32>
    "tpu.trace_start"() <{level = 10 : i32, message = "gtd,gdc->gtc"}> : () -> ()
    %cst_13 = arith.constant dense<0.000000e+00> : vector<12x8x8xf32>
    %30 = tpu.matmul %28, %29, %cst_13 {dimension_numbers = #tpu.dot_dimension_numbers<[2], [1], [1], [2], [0, 0, 0, 1, 1, 2], [0], [0]>} : vector<12x8x32xf32>, vector<12x32x8xf32>, vector<12x8x8xf32> -> vector<12x8x8xf32>
    "tpu.trace_stop"() : () -> ()
    %31 = vector.extract_strided_slice %30 {offsets = [0, 0, 0], sizes = [4, 8, 8], strides = [1, 1, 1]} : vector<12x8x8xf32> to vector<4x8x8xf32>
    %32 = vector.extract_strided_slice %30 {offsets = [4, 0, 0], sizes = [4, 8, 8], strides = [1, 1, 1]} : vector<12x8x8xf32> to vector<4x8x8xf32>
    %33 = vector.extract_strided_slice %30 {offsets = [8, 0, 0], sizes = [4, 8, 8], strides = [1, 1, 1]} : vector<12x8x8xf32> to vector<4x8x8xf32>
    "tpu.trace_start"() <{level = 10 : i32, message = "hid,hjd->hij"}> : () -> ()
    %cst_14 = arith.constant dense<0.000000e+00> : vector<4x8x8xf32>
    %34 = tpu.matmul %31, %32, %cst_14 {dimension_numbers = #tpu.dot_dimension_numbers<[2], [2], [1], [1], [0, 0, 0, 1, 1, 1], [0], [0]>} : vector<4x8x8xf32>, vector<4x8x8xf32>, vector<4x8x8xf32> -> vector<4x8x8xf32>
    "tpu.trace_stop"() : () -> ()
    %35 = tpu.iota {dimensions = array<i32: 0>} : vector<8x8xi32>
    %36 = tpu.iota {dimensions = array<i32: 1>} : vector<8x8xi32>
    %37 = arith.cmpi sle, %36, %35 : vector<8x8xi32>
    %38 = vector.shape_cast %37 : vector<8x8xi1> to vector<1x8x8xi1>
    %cst_15 = arith.constant -1.000000e+30 : f32
    %39 = vector.shape_cast %38 : vector<1x8x8xi1> to vector<1x8x8xi1>
    %40 = vector.broadcast %39 : vector<1x8x8xi1> to vector<4x8x8xi1>
    %41 = vector.broadcast %cst_15 : f32 to vector<4x8x8xf32>
    %42 = arith.select %40, %34, %41 : vector<4x8x8xi1>, vector<4x8x8xf32>
    %cst_16 = arith.constant dense<0xFF800000> : vector<4x8xf32>
    %43 = vector.multi_reduction <maximumf>, %42, %cst_16 [2] : vector<4x8x8xf32> to vector<4x8xf32>
    %44 = vector.shape_cast %43 : vector<4x8xf32> to vector<4x8x1xf32>
    %45 = vector.broadcast %44 : vector<4x8x1xf32> to vector<4x8x8xf32>
    %46 = arith.subf %42, %45 : vector<4x8x8xf32>
    %47 = math.exp %46 : vector<4x8x8xf32>
    %cst_17 = arith.constant dense<0.000000e+00> : vector<4x8xf32>
    %48 = vector.multi_reduction <add>, %47, %cst_17 [2] : vector<4x8x8xf32> to vector<4x8xf32>
    %49 = vector.shape_cast %48 : vector<4x8xf32> to vector<4x8x1xf32>
    %50 = vector.broadcast %49 : vector<4x8x1xf32> to vector<4x8x8xf32>
    %51 = arith.divf %47, %50 : vector<4x8x8xf32>
    "tpu.trace_start"() <{level = 10 : i32, message = "hij,hjd->hid"}> : () -> ()
    %cst_18 = arith.constant dense<0.000000e+00> : vector<4x8x8xf32>
    %52 = tpu.matmul %51, %33, %cst_18 {dimension_numbers = #tpu.dot_dimension_numbers<[2], [1], [1], [2], [0, 0, 0, 1, 1, 2], [0], [0]>} : vector<4x8x8xf32>, vector<4x8x8xf32>, vector<4x8x8xf32> -> vector<4x8x8xf32>
    "tpu.trace_stop"() : () -> ()
    %53 = vector.extract_strided_slice %52 {offsets = [0, 0, 0], sizes = [1, 8, 8], strides = [1, 1, 1]} : vector<4x8x8xf32> to vector<1x8x8xf32>
    %54 = vector.shape_cast %53 : vector<1x8x8xf32> to vector<8x8xf32>
    %c0_19 = arith.constant 0 : index
    %c0_20 = arith.constant 0 : index
    %c0_21 = arith.constant 0 : index
    %55 = vector.load %arg5[%c0_19, %c0_20, %c0_21] : memref<4x8x32xf32, #tpu.memory_space<vmem>>, vector<1x8x32xf32>
    %56 = vector.shape_cast %55 : vector<1x8x32xf32> to vector<8x32xf32>
    %cst_22 = arith.constant dense<0.000000e+00> : vector<8x32xf32>
    %57 = tpu.matmul %54, %56, %cst_22 {dimension_numbers = #tpu.dot_dimension_numbers<[1], [0], [0], [1], [0, 0, 1, 1], [], []>} : vector<8x8xf32>, vector<8x32xf32>, vector<8x32xf32> -> vector<8x32xf32>
    %58 = vector.extract_strided_slice %52 {offsets = [1, 0, 0], sizes = [1, 8, 8], strides = [1, 1, 1]} : vector<4x8x8xf32> to vector<1x8x8xf32>
    %59 = vector.shape_cast %58 : vector<1x8x8xf32> to vector<8x8xf32>
    %c1 = arith.constant 1 : index
    %c0_23 = arith.constant 0 : index
    %c0_24 = arith.constant 0 : index
    %60 = vector.load %arg5[%c1, %c0_23, %c0_24] : memref<4x8x32xf32, #tpu.memory_space<vmem>>, vector<1x8x32xf32>
    %61 = vector.shape_cast %60 : vector<1x8x32xf32> to vector<8x32xf32>
    %cst_25 = arith.constant dense<0.000000e+00> : vector<8x32xf32>
    %62 = tpu.matmul %59, %61, %cst_25 {dimension_numbers = #tpu.dot_dimension_numbers<[1], [0], [0], [1], [0, 0, 1, 1], [], []>} : vector<8x8xf32>, vector<8x32xf32>, vector<8x32xf32> -> vector<8x32xf32>
    %63 = arith.addf %57, %62 : vector<8x32xf32>
    %64 = vector.extract_strided_slice %52 {offsets = [2, 0, 0], sizes = [1, 8, 8], strides = [1, 1, 1]} : vector<4x8x8xf32> to vector<1x8x8xf32>
    %65 = vector.shape_cast %64 : vector<1x8x8xf32> to vector<8x8xf32>
    %c2 = arith.constant 2 : index
    %c0_26 = arith.constant 0 : index
    %c0_27 = arith.constant 0 : index
    %66 = vector.load %arg5[%c2, %c0_26, %c0_27] : memref<4x8x32xf32, #tpu.memory_space<vmem>>, vector<1x8x32xf32>
    %67 = vector.shape_cast %66 : vector<1x8x32xf32> to vector<8x32xf32>
    %cst_28 = arith.constant dense<0.000000e+00> : vector<8x32xf32>
    %68 = tpu.matmul %65, %67, %cst_28 {dimension_numbers = #tpu.dot_dimension_numbers<[1], [0], [0], [1], [0, 0, 1, 1], [], []>} : vector<8x8xf32>, vector<8x32xf32>, vector<8x32xf32> -> vector<8x32xf32>
    %69 = arith.addf %63, %68 : vector<8x32xf32>
    %70 = vector.extract_strided_slice %52 {offsets = [3, 0, 0], sizes = [1, 8, 8], strides = [1, 1, 1]} : vector<4x8x8xf32> to vector<1x8x8xf32>
    %71 = vector.shape_cast %70 : vector<1x8x8xf32> to vector<8x8xf32>
    %c3 = arith.constant 3 : index
    %c0_29 = arith.constant 0 : index
    %c0_30 = arith.constant 0 : index
    %72 = vector.load %arg5[%c3, %c0_29, %c0_30] : memref<4x8x32xf32, #tpu.memory_space<vmem>>, vector<1x8x32xf32>
    %73 = vector.shape_cast %72 : vector<1x8x32xf32> to vector<8x32xf32>
    %cst_31 = arith.constant dense<0.000000e+00> : vector<8x32xf32>
    %74 = tpu.matmul %71, %73, %cst_31 {dimension_numbers = #tpu.dot_dimension_numbers<[1], [0], [0], [1], [0, 0, 1, 1], [], []>} : vector<8x8xf32>, vector<8x32xf32>, vector<8x32xf32> -> vector<8x32xf32>
    %75 = arith.addf %69, %74 : vector<8x32xf32>
    %c0_32 = arith.constant 0 : index
    %c0_33 = arith.constant 0 : index
    %76 = vector.load %arg6[%c0_32, %c0_33] : memref<1x32xf32, #tpu.memory_space<vmem>>, vector<1x32xf32>
    %77 = vector.broadcast %76 : vector<1x32xf32> to vector<8x32xf32>
    %78 = arith.addf %75, %77 : vector<8x32xf32>
    %79 = arith.addf %1, %78 : vector<8x32xf32>
    %c0_34 = arith.constant 0 : index
    %c0_35 = arith.constant 0 : index
    %80 = vector.load %arg7[%c0_34, %c0_35] : memref<1x32xf32, #tpu.memory_space<vmem>>, vector<1x32xf32>
    %c0_36 = arith.constant 0 : index
    %c0_37 = arith.constant 0 : index
    %81 = vector.load %arg8[%c0_36, %c0_37] : memref<1x32xf32, #tpu.memory_space<vmem>>, vector<1x32xf32>
    %cst_38 = arith.constant dense<0.000000e+00> : vector<8xf32>
    %82 = vector.multi_reduction <add>, %79, %cst_38 [1] : vector<8x32xf32> to vector<8xf32>
    %83 = vector.shape_cast %82 : vector<8xf32> to vector<8x1xf32>
    %cst_39 = arith.constant 3.200000e+01 : f32
    %84 = vector.broadcast %cst_39 : f32 to vector<8x1xf32>
    %85 = arith.divf %83, %84 : vector<8x1xf32>
    %86 = vector.broadcast %85 : vector<8x1xf32> to vector<8x32xf32>
    %87 = arith.subf %79, %86 : vector<8x32xf32>
    %88 = arith.mulf %87, %87 : vector<8x32xf32>
    %cst_40 = arith.constant dense<0.000000e+00> : vector<8xf32>
    %89 = vector.multi_reduction <add>, %88, %cst_40 [1] : vector<8x32xf32> to vector<8xf32>
    %90 = vector.shape_cast %89 : vector<8xf32> to vector<8x1xf32>
    %cst_41 = arith.constant 3.200000e+01 : f32
    %91 = vector.broadcast %cst_41 : f32 to vector<8x1xf32>
    %92 = arith.divf %90, %91 : vector<8x1xf32>
    %cst_42 = arith.constant 9.99999974E-6 : f32
    %93 = vector.broadcast %cst_42 : f32 to vector<8x1xf32>
    %94 = arith.addf %92, %93 : vector<8x1xf32>
    %95 = math.rsqrt %94 : vector<8x1xf32>
    %96 = vector.broadcast %85 : vector<8x1xf32> to vector<8x32xf32>
    %97 = arith.subf %79, %96 : vector<8x32xf32>
    %98 = vector.broadcast %95 : vector<8x1xf32> to vector<8x32xf32>
    %99 = arith.mulf %97, %98 : vector<8x32xf32>
    %100 = vector.broadcast %80 : vector<1x32xf32> to vector<8x32xf32>
    %101 = arith.mulf %100, %99 : vector<8x32xf32>
    %102 = vector.broadcast %81 : vector<1x32xf32> to vector<8x32xf32>
    %103 = arith.addf %101, %102 : vector<8x32xf32>
    %c0_43 = arith.constant 0 : index
    %c0_44 = arith.constant 0 : index
    %104 = vector.load %arg9[%c0_43, %c0_44] : memref<32x128xf32, #tpu.memory_space<vmem>>, vector<32x128xf32>
    %cst_45 = arith.constant dense<0.000000e+00> : vector<8x128xf32>
    %105 = tpu.matmul %103, %104, %cst_45 {dimension_numbers = #tpu.dot_dimension_numbers<[1], [0], [0], [1], [0, 0, 1, 1], [], []>} : vector<8x32xf32>, vector<32x128xf32>, vector<8x128xf32> -> vector<8x128xf32>
    %c0_46 = arith.constant 0 : index
    %c0_47 = arith.constant 0 : index
    %106 = vector.load %arg10[%c0_46, %c0_47] : memref<1x128xf32, #tpu.memory_space<vmem>>, vector<1x128xf32>
    %107 = vector.broadcast %106 : vector<1x128xf32> to vector<8x128xf32>
    %108 = arith.addf %105, %107 : vector<8x128xf32>
    %cst_48 = arith.constant 5.000000e-01 : f32
    %109 = vector.broadcast %cst_48 : f32 to vector<8x128xf32>
    %110 = arith.mulf %109, %108 : vector<8x128xf32>
    %cst_49 = arith.constant 0.636619746 : f32
    %111 = math.sqrt %cst_49 : f32
    %cst_50 = arith.constant 4.471500e-02 : f32
    %112 = vector.broadcast %cst_50 : f32 to vector<8x128xf32>
    %113 = arith.mulf %112, %108 : vector<8x128xf32>
    %114 = arith.mulf %113, %108 : vector<8x128xf32>
    %115 = arith.mulf %114, %108 : vector<8x128xf32>
    %116 = arith.addf %108, %115 : vector<8x128xf32>
    %117 = vector.broadcast %111 : f32 to vector<8x128xf32>
    %118 = arith.mulf %117, %116 : vector<8x128xf32>
    %119 = math.tanh %118 : vector<8x128xf32>
    %cst_51 = arith.constant 1.000000e+00 : f32
    %120 = vector.broadcast %cst_51 : f32 to vector<8x128xf32>
    %121 = arith.addf %120, %119 : vector<8x128xf32>
    %122 = arith.mulf %110, %121 : vector<8x128xf32>
    %c0_52 = arith.constant 0 : index
    %c0_53 = arith.constant 0 : index
    %123 = vector.load %arg11[%c0_52, %c0_53] : memref<128x32xf32, #tpu.memory_space<vmem>>, vector<128x32xf32>
    %cst_54 = arith.constant dense<0.000000e+00> : vector<8x32xf32>
    %124 = tpu.matmul %122, %123, %cst_54 {dimension_numbers = #tpu.dot_dimension_numbers<[1], [0], [0], [1], [0, 0, 1, 1], [], []>} : vector<8x128xf32>, vector<128x32xf32>, vector<8x32xf32> -> vector<8x32xf32>
    %c0_55 = arith.constant 0 : index
    %c0_56 = arith.constant 0 : index
    %125 = vector.load %arg12[%c0_55, %c0_56] : memref<1x32xf32, #tpu.memory_space<vmem>>, vector<1x32xf32>
    %126 = vector.broadcast %125 : vector<1x32xf32> to vector<8x32xf32>
    %127 = arith.addf %124, %126 : vector<8x32xf32>
    %128 = arith.addf %79, %127 : vector<8x32xf32>
    %c0_57 = arith.constant 0 : index
    %c0_58 = arith.constant 0 : index
    %c0_59 = arith.constant 0 : index
    %129 = vector.load %arg13[%c0_57, %c0_58, %c0_59] : memref<1x8x32xf32, #tpu.memory_space<vmem>>, vector<1x8x32xf32>
    %130 = vector.shape_cast %129 : vector<1x8x32xf32> to vector<8x32xf32>
    %131 = vector.shape_cast %128 : vector<8x32xf32> to vector<1x8x32xf32>
    tpu.vector_store %arg13[%c0_57, %c0_58, %c0_59], %131 {strides = array<i32>} : memref<1x8x32xf32, #tpu.memory_space<vmem>>, vector<1x8x32xf32>,
    return
  }
  func.func @transform_0(%arg0: i32) -> (i32, i32, i32) {
    %c0_i32 = arith.constant 0 : i32
    %c0_i32_0 = arith.constant 0 : i32
    %c0_i32_1 = arith.constant 0 : i32
    return %arg0, %c0_i32, %c0_i32_0 : i32, i32, i32
  }
  func.func @transform_1(%arg0: i32) -> (i32, i32) {
    %c0_i32 = arith.constant 0 : i32
    %c0_i32_0 = arith.constant 0 : i32
    %c0_i32_1 = arith.constant 0 : i32
    return %c0_i32, %c0_i32_0 : i32, i32
  }
  func.func @transform_2(%arg0: i32) -> (i32, i32) {
    %c0_i32 = arith.constant 0 : i32
    %c0_i32_0 = arith.constant 0 : i32
    %c0_i32_1 = arith.constant 0 : i32
    return %c0_i32, %c0_i32_0 : i32, i32
  }
  func.func @transform_3(%arg0: i32) -> (i32, i32, i32) {
    %c0_i32 = arith.constant 0 : i32
    %c0_i32_0 = arith.constant 0 : i32
    %c0_i32_1 = arith.constant 0 : i32
    %c0_i32_2 = arith.constant 0 : i32
    return %c0_i32, %c0_i32_0, %c0_i32_1 : i32, i32, i32
  }
  func.func @transform_4(%arg0: i32) -> (i32, i32, i32) {
    %c0_i32 = arith.constant 0 : i32
    %c0_i32_0 = arith.constant 0 : i32
    %c0_i32_1 = arith.constant 0 : i32
    %c0_i32_2 = arith.constant 0 : i32
    return %c0_i32, %c0_i32_0, %c0_i32_1 : i32, i32, i32
  }
  func.func @transform_5(%arg0: i32) -> (i32, i32) {
    %c0_i32 = arith.constant 0 : i32
    %c0_i32_0 = arith.constant 0 : i32
    %c0_i32_1 = arith.constant 0 : i32
    return %c0_i32, %c0_i32_0 : i32, i32
  }
  func.func @transform_6(%arg0: i32) -> (i32, i32) {
    %c0_i32 = arith.constant 0 : i32
    %c0_i32_0 = arith.constant 0 : i32
    %c0_i32_1 = arith.constant 0 : i32
    return %c0_i32, %c0_i32_0 : i32, i32
  }
  func.func @transform_7(%arg0: i32) -> (i32, i32) {
    %c0_i32 = arith.constant 0 : i32
    %c0_i32_0 = arith.constant 0 : i32
    %c0_i32_1 = arith.constant 0 : i32
    return %c0_i32, %c0_i32_0 : i32, i32
  }
  func.func @transform_8(%arg0: i32) -> (i32, i32) {
    %c0_i32 = arith.constant 0 : i32
    %c0_i32_0 = arith.constant 0 : i32
    %c0_i32_1 = arith.constant 0 : i32
    return %c0_i32, %c0_i32_0 : i32, i32
  }
  func.func @transform_9(%arg0: i32) -> (i32, i32) {
    %c0_i32 = arith.constant 0 : i32
    %c0_i32_0 = arith.constant 0 : i32
    %c0_i32_1 = arith.constant 0 : i32
    return %c0_i32, %c0_i32_0 : i32, i32
  }
  func.func @transform_10(%arg0: i32) -> (i32, i32) {
    %c0_i32 = arith.constant 0 : i32
    %c0_i32_0 = arith.constant 0 : i32
    %c0_i32_1 = arith.constant 0 : i32
    return %c0_i32, %c0_i32_0 : i32, i32
  }
  func.func @transform_11(%arg0: i32) -> (i32, i32) {
    %c0_i32 = arith.constant 0 : i32
    %c0_i32_0 = arith.constant 0 : i32
    %c0_i32_1 = arith.constant 0 : i32
    return %c0_i32, %c0_i32_0 : i32, i32
  }
  func.func @transform_12(%arg0: i32) -> (i32, i32, i32) {
    %c0_i32 = arith.constant 0 : i32
    %c0_i32_0 = arith.constant 0 : i32
    %c0_i32_1 = arith.constant 0 : i32
    return %arg0, %c0_i32, %c0_i32_0 : i32, i32, i32
  }
}

</mosaic_0001>

<bundles_post_ra>
// kernel: tpu_custom_call.1
= control target key start
LH: loop header
LB: loop body
LE: loop exit
PB: predicated region body
PF: predicated region fallthrough
CT: control target
= control target key end

     0   :  { %s1977_s0 = inlined_call_operand.vmem [shape: f32[2,8,32], index: 0, kind: input, shape index: {}]   ;;  %s1978_s1 = inlined_call_operand.vmem [shape: f32[1,32], index: 1, kind: input, shape index: {}]   ;;  %s1979_s2 = inlined_call_operand.vmem [shape: f32[1,32], index: 2, kind: input, shape index: {}]   ;;  %s1980_s3 = inlined_call_operand.vmem [shape: f32[12,32,8], index: 3, kind: input, shape index: {}]   ;;  %s1981_s4 = inlined_call_operand.vmem [shape: f32[4,8,32], index: 4, kind: input, shape index: {}]   ;;  %s1982_s5 = inlined_call_operand.vmem [shape: f32[1,32], index: 5, kind: input, shape index: {}]   ;;  %s1983_s6 = inlined_call_operand.vmem [shape: f32[1,32], index: 6, kind: input, shape index: {}]   ;;  %s1984_s7 = inlined_call_operand.vmem [shape: f32[1,32], index: 7, kind: input, shape index: {}]   ;;  %s1985_s8 = inlined_call_operand.vmem [shape: f32[32,128], index: 8, kind: input, shape index: {}]   ;;  %s1986_s9 = inlined_call_operand.vmem [shape: f32[1,128], index: 9, kind: input, shape index: {}]   ;;  %s1987_s10 = inlined_call_operand.vmem [shape: f32[128,32], index: 10, kind: input, shape index: {}]   ;;  %s1988_s11 = inlined_call_operand.vmem [shape: f32[1,32], index: 11, kind: input, shape index: {}]   ;;  %s1989_s12 = inlined_call_operand.hbm [shape: f32[2,8,32], index: 12, kind: output, shape index: {}]  }
   0x1   :  { %1990 = sst [smem:[#allocation5_spill]] %s1977_s0 }
   0x2   :  { %1991 = sst [smem:[#allocation6_spill]] %s1978_s1 }
   0x3   :  { %1992 = sst [smem:[#allocation7_spill]] %s1979_s2 }
   0x4   :  { %17 = vsyncpa [#allocation3], 0 }
   0x5   :  { %19 = vsyncpa [#allocation3 + $0x1], 0  ;;  %s1584_s21 = smov 0   ;;  %s1586_s22 = smov 0  }
   0x6   :  { %s1588_s23 = smov 0   ;;  %s1590_s24 = smov 0  }
   0x7 LB: > { %s1605_s25 = sadd.s32 4294967295, %s1516_s24   ;;  %s1341_s26 = sadd.s32 4294967294, %s1516_s24   ;;  %s1516_s24 = sphi %s1590_s24, %s2001_s24   ;;  %s1512_s23 = sphi %s1588_s23, %s2000_s23   ;;  %s1508_s22 = sphi %s1586_s22, %s1999_s22   ;;  %s1504_s21 = sphi %s1584_s21, %s1998_s21  }
   0x8   : > { %s1609_s27 = sadd.s32 1, %s1516_s24   ;;  %s289_s28 = sadd.s32 1, %s1512_s23 }
   0x9   : > { %s286_s29 = ssub.s32 %s1516_s24, %s1609_s27  ;;  %p299_p0 = scmp.ne.s32.totalorder %s1512_s23, %s1508_s22 }
   0xa   : > { %p287_p1 = scmp.eq.s32.totalorder %s286_s29, 0  ;;  %p300_p2 = scmp.eq.s32.totalorder %s1605_s25, 1 }
   0xb   : > { %p305_p3 = scmp.ne.s32.totalorder %s1508_s22, %s1504_s21  ;;  %p306_p4 = scmp.eq.s32.totalorder %s1341_s26, 1 }
   0xc   : > { %s1620_s30 = scalar_select %p287_p1, %s1512_s23, %s289_s28  }
   0xd   : > { %p1622_p5 = por %p300_p2, %p299_p0  ;;  %p1626_p6 = por %p306_p4, %p305_p3 }
   0xe   : > { %p1344_p7 = scmp.ge.s32.totalorder %s1516_s24, 1  ;;  %p364_p8 = scmp.lt.s32.totalorder %s1516_s24, 3 }
  0x10   : > { %p365_p9 = pnand %p1344_p7, %p364_p8 }
  0x11   : > { %p405_p10 = scmp.lt.s32.totalorder (!%p365_p9), %s1605_s25, 1  ;;  %s1995_s0 = sld [smem:[#allocation5_spill]] (!%p365_p9) }
  0x12   : > { %368 = sbr.rel (%p365_p9) target bundleno = 1672 (0x688), region = 68  ;;  %s1996_s1 = sld [smem:[#allocation6_spill]] (!%p365_p9) }
  0x13   : > { %s1997_s2 = sld [smem:[#allocation7_spill]] (!%p365_p9)  ;;  %s402_s17 = sand.u32 (!%p365_p9), 1, %s1508_s22  }
  0x14   : > { %s1345_s18 = sshll.u32 (!%p365_p9), %s402_s17, 3 }
  0x17   : > { %s406_s15 = scalar_select %p405_p10, %s1605_s25, 1  ;;  %vm412_vm0 = vcmask 261120   ;;  %v1518_v2 = vmov 32.0   ;;  %v453_v14 = vld [vmem:[%s1980_s3 + $0x18] sm:$0xff]  ;;  %v452_v18 = vld [vmem:[%s1980_s3 + $0x10] sm:$0xff]  ;;  %v451_v22 = vld [vmem:[%s1980_s3 + $0x8] sm:$0xff] }
  0x18   : > { %1430 = vrcp.f32 %v1518_v2  ;;  %v457_v15 = vld [vmem:[%s1980_s3 + $0x38] sm:$0xff]  ;;  %513 = vmatpush.msra.mxu0 %v453_v14  ;;  %v456_v19 = vld [vmem:[%s1980_s3 + $0x30] sm:$0xff]  ;;  %v455_v23 = vld [vmem:[%s1980_s3 + $0x28] sm:$0xff]  ;;  %vm741_vm5 = vcmask 64512  }
  0x19   : > { %s1346_s16 = sshll.u32 %s406_s15, 3  ;;  %v465_v16 = vld [vmem:[%s1980_s3 + $0x78] sm:$0xff]  ;;  %533 = vmatpush.msra.mxu2 %v457_v15  ;;  %v464_v20 = vld [vmem:[%s1980_s3 + $0x70] sm:$0xff]  ;;  %v463_v24 = vld [vmem:[%s1980_s3 + $0x68] sm:$0xff]  ;;  %s404_s15 = scalar_lea.vmem [#allocation2], %s1345_s18 }
  0x1a   : > { %s408_s19 = scalar_lea.vmem %s1995_s0, %s1346_s16  ;;  %v489_v17 = vld [vmem:[%s1980_s3 + $0x138] sm:$0xff]  ;;  %573 = vmatpush.msra.mxu3 %v465_v16  ;;  %514 = vmatpush.msra.mxu0 %v452_v18  ;;  %v488_v21 = vld [vmem:[%s1980_s3 + $0x130] sm:$0xff]  ;;  %v487_v25 = vld [vmem:[%s1980_s3 + $0x128] sm:$0xff]  ;;  %s1380_s0 = sshll.u32 %s1605_s25, 3 }
  0x1b   : > { %v1637_v0 = vld [vmem:[%s408_s19] sm:$0xff]  ;;  %693 = vmatpush.msra.mxu1 %v489_v17  ;;  %534 = vmatpush.msra.mxu2 %v456_v19  ;;  %v461_v30 = vld [vmem:[%s1980_s3 + $0x58] sm:$0xff]  ;;  %v460_v33 = vld [vmem:[%s1980_s3 + $0x50] sm:$0xff]  ;;  %s1277_s29 = scalar_lea.hbm %s1989_s12, %s1380_s0  ;;  %s1279_s16 = sshll.u32 %s404_s15, 4  ;;  %s1280_s16 = int_to_ptr.vmem [resolvable:$true] %s1279_s16 }
  0x1c   : > { %v413_v1 = vsel %vm412_vm0, %v1637_v0, 0.0  ;;  %574 = vmatpush.msra.mxu3 %v464_v20  ;;  %515 = vmatpush.msra.mxu0 %v451_v22  ;;  %v450_v26 = vld [vmem:[%s1980_s3] sm:$0xff]  ;;  %v469_v31 = vld [vmem:[%s1980_s3 + $0x98] sm:$0xff]  ;;  %v468_v34 = vld [vmem:[%s1980_s3 + $0x90] sm:$0xff]  ;;  %s1267_s25 = scalar_lea.sflag [#allocation3], %s402_s17  ;;  %s1474_s18 = scalar_lea.hbm %s1989_s12, 16 }
  0x1d   : > { %414 = vadd.xlane.f32.xlu0 %v413_v1  ;;  %694 = vmatpush.msra.mxu1 %v488_v21  ;;  %v454_v27 = vld [vmem:[%s1980_s3 + $0x20] sm:$0xff]  ;;  %v473_v32 = vld [vmem:[%s1980_s3 + $0xb8] sm:$0xff]  ;;  %v472_v35 = vld [vmem:[%s1980_s3 + $0xb0] sm:$0xff] }
  0x1e   : > { %v1431_v3 = vpop.eup %1430  ;;  %535 = vmatpush.msra.mxu2 %v455_v23  ;;  %575 = vmatpush.msra.mxu3 %v463_v24  ;;  %v462_v28 = vld [vmem:[%s1980_s3 + $0x60] sm:$0xff]  ;;  %v459_v37 = vld [vmem:[%s1980_s3 + $0x48] sm:$0xff]  ;;  %v477_v57 = vld [vmem:[%s1980_s3 + $0xd8] sm:$0xff] }
  0x1f   : > { %v417_v4 = vmul.f32 32.0, %v1431_v3  ;;  %vm421_vm1 = vweird.f32 %v1431_v3  ;;  %695 = vmatpush.msra.mxu1 %v487_v25  ;;  %516 = vmatpush.msra.mxu0 %v450_v26  ;;  %v486_v29 = vld [vmem:[%s1980_s3 + $0x120] sm:$0xff]  ;;  %v467_v38 = vld [vmem:[%s1980_s3 + $0x88] sm:$0xff]  ;;  %v481_v58 = vld [vmem:[%s1980_s3 + $0xf8] sm:$0xff] }
  0x20   : > { %536 = vmatpush.msra.mxu2 %v454_v27  ;;  %576 = vmatpush.msra.mxu3 %v462_v28  ;;  %v471_v40 = vld [vmem:[%s1980_s3 + $0xa8] sm:$0xff]  ;;  %v458_v41 = vld [vmem:[%s1980_s3 + $0x40] sm:$0xff]  ;;  %v485_v59 = vld [vmem:[%s1980_s3 + $0x118] sm:$0xff]  ;;  %v846_v27 = vlaneseq }
  0x21   : > { %v418_v5 = vsub.f32 1.0, %v417_v4  ;;  %696 = vmatpush.msra.mxu1 %v486_v29  ;;  %593 = vmatpush.msrb.mxu0 %v469_v31  ;;  %v466_v42 = vld [vmem:[%s1980_s3 + $0x80] sm:$0xff]  ;;  %v476_v60 = vld [vmem:[%s1980_s3 + $0xd0] sm:$0xff]  ;;  %v475_v63 = vld [vmem:[%s1980_s3 + $0xc8] sm:$0xff] }
  0x22   : > { %553 = vmatpush.msrb.mxu2 %v461_v30  ;;  %613 = vmatpush.msrb.mxu3 %v473_v32  ;;  %v470_v44 = vld [vmem:[%s1980_s3 + $0xa0] sm:$0xff]  ;;  %v480_v61 = vld [vmem:[%s1980_s3 + $0xf0] sm:$0xff]  ;;  %v479_v1 = vld [vmem:[%s1980_s3 + $0xe8] sm:$0xff]  ;;  %v847_v28 = vshrl.u32 %v846_v27, 7  ;;  %v849_v29 = vand.u32 127, %v846_v27 }
  0x23   : > { %v419_v6 = vmul.f32 %v1431_v3, %v418_v5  ;;  %594 = vmatpush.msrb.mxu0 %v468_v34  ;;  %v1423_v51 = vld [vmem:[%s1996_s1] ss:$0 sm:$0xff]  ;;  %v484_v62 = vld [vmem:[%s1980_s3 + $0x110] sm:$0xff]  ;;  %v483_v2 = vld [vmem:[%s1980_s3 + $0x108] sm:$0xff]  ;;  %s1281_s1 = sshll.u32 %s1277_s29, 4  ;;  %s1282_s1 = int_to_ptr.hbm [resolvable:$true] %s1281_s1 }
  0x24   : > { %554 = vmatpush.msrb.mxu2 %v460_v33  ;;  %614 = vmatpush.msrb.mxu3 %v472_v35  ;;  %v1424_v53 = vld [vmem:[%s1997_s2] ss:$0 sm:$0xff]  ;;  %vm850_vm6 = vcmp.le.s32.totalorder %v849_v29, %v847_v28  ;;  %s1468_s2 = sshra.s32 %s1282_s1, 4  ;;  %s1469_s2 = int_to_ptr.hbm [resolvable:$true] %s1468_s2 }
  0x25   : > { %v420_v7 = vadd.f32 %v1431_v3, %v419_v6  ;;  %595 = vmatpush.msrb.mxu0 %v467_v38  ;;  %v478_v4 = vld [vmem:[%s1980_s3 + $0xe0] sm:$0xff]  ;;  %v493_v6 = vld [vmem:[%s1980_s3 + $0x158] sm:$0xff]  ;;  %s1470_s19 = scalar_lea.hbm %s1469_s2, 8  ;;  %p1475_p0 = scmp.lt.s32.totalorder %s1469_s2, %s1989_s12 }
  0x26   : > { %555 = vmatpush.msrb.mxu2 %v459_v37  ;;  %615 = vmatpush.msrb.mxu3 %v471_v40  ;;  %v482_v5 = vld [vmem:[%s1980_s3 + $0x100] sm:$0xff]  ;;  %p1471_p11 = scmp.ne.s32.totalorder %s1469_s2, %s1470_s19  ;;  %p1476_p1 = scmp.lt.s32.totalorder %s1474_s18, %s1470_s19 }
  0x27   : > { %v1641_v8 = vsel %vm421_vm1, %v1431_v3, %v420_v7  ;;  %596 = vmatpush.msrb.mxu0 %v466_v42  ;;  %v474_v3 = vld [vmem:[%s1980_s3 + $0xc0] sm:$0xff]  ;;  %v497_v7 = vld [vmem:[%s1980_s3 + $0x178] sm:$0xff] }
  0x28   : > { %556 = vmatpush.msrb.mxu2 %v458_v41  ;;  %616 = vmatpush.msrb.mxu3 %v470_v44  ;;  %v494_v14 = vld [vmem:[%s1980_s3 + $0x160] sm:$0xff]  ;;  %p1472_p12 = pnand %p1471_p11, %p1622_p5  ;;  %p1477_p2 = por %p1476_p1, %p1475_p0 }
  0x2a   : > { %p1473_p13 = pneg %p1472_p12 }
  0x2c   : > { %p1478_p3 = pnand %p1477_p2, %p1473_p13 }
  0x90   : > { %v415_v9 = vpop.xlane.xlu0 %414 }
  0x91   : > { %v423_v10 = vmul.f32 %v1641_v8, %v415_v9  ;;  %v492_v9 = vld [vmem:[%s1980_s3 + $0x150] sm:$0xff] }
  0x93   : > { %v1645_v11 = vsub.f32 %v1637_v0, %v423_v10  ;;  %v496_v10 = vld [vmem:[%s1980_s3 + $0x170] sm:$0xff] }
  0x95   : > { %v425_v12 = vmul.f32 %v1645_v11, %v1645_v11 }
  0x97   : > { %v426_v13 = vsel %vm412_vm0, %v425_v12, 0.0  ;;  %v495_v12 = vld [vmem:[%s1980_s3 + $0x168] sm:$0xff] }
  0x98   : > { %427 = vadd.xlane.f32.xlu0 %v426_v13  ;;  %v490_v13 = vld [vmem:[%s1980_s3 + $0x140] sm:$0xff] }
 0x10b   : > { %v428_v36 = vpop.xlane.xlu0 %427 }
 0x10c   : > { %v429_v39 = vmul.f32 %v428_v36, %v1641_v8 }
 0x10e   : > { %v430_v43 = vadd.f32 1e-05, %v429_v39 }
 0x110   : > { %1432 = vrsqrt.f32 %v430_v43  ;;  %vm437_vm3 = vweird.f32 %v430_v43 }
 0x116   : > { %v1433_v45 = vpop.eup %1432 }
 0x117   : > { %v432_v46 = vmul.f32 %v1433_v45, %v430_v43  ;;  %vm438_vm2 = vweird.f32 %v1433_v45 }
 0x118   : > { %vm439_vm4 = vmor %vm437_vm3, %vm438_vm2 }
 0x119   : > { %v433_v47 = vmul.f32 %v1433_v45, %v432_v46 }
 0x11b   : > { %v434_v48 = vmul.f32 0.5, %v433_v47 }
 0x11d   : > { %v435_v49 = vsub.f32 1.5, %v434_v48 }
 0x11f   : > { %v436_v50 = vmul.f32 %v1433_v45, %v435_v49 }
 0x121   : > { %v440_v52 = vsel %vm439_vm4, %v1433_v45, %v436_v50 }
 0x122   : > { %v441_v54 = vmul.f32 %v440_v52, %v1645_v11  ;;  %v491_v11 = vld [vmem:[%s1980_s3 + $0x148] sm:$0xff] }
 0x124   : > { %v445_v55 = vmul.f32 %v1423_v51, %v441_v54 }
 0x126   : > { %v449_v56 = vadd.f32 %v1424_v53, %v445_v55 }
 0x128   : > { %1347 = vmatmul.msk.f32.vlgmr.msra.gmra.mxu0 %vm412_vm0, %v449_v56  ;;  %1348 = vmatmul.msk.f32.vlgmr.msra.gmra.mxu2 %vm412_vm0, %v449_v56 }
 0x129   : > { %1350 = vmatmul.msk.f32.vlgmr.msra.gmra.mxu3 %vm412_vm0, %v449_v56  ;;  %1356 = vmatmul.msk.f32.vlgmr.msra.gmra.mxu1 %vm412_vm0, %v449_v56 }
 0x12a   : > { %633 = vmatpush.msra.mxu2 %v477_v57  ;;  %653 = vmatpush.msra.mxu3 %v481_v58 }
 0x12b   : > { %673 = vmatpush.msra.mxu0 %v485_v59 }
 0x12c   : > { %634 = vmatpush.msra.mxu2 %v476_v60  ;;  %654 = vmatpush.msra.mxu3 %v480_v61 }
 0x12d   : > { %674 = vmatpush.msra.mxu0 %v484_v62 }
 0x12e   : > { %635 = vmatpush.msra.mxu2 %v475_v63  ;;  %655 = vmatpush.msra.mxu3 %v479_v1 }
 0x12f   : > { %675 = vmatpush.msra.mxu0 %v483_v2 }
 0x130   : > { %1349 = vmatmul.msk.f32.vlgmr.msrb.gmra.mxu2 %vm412_vm0, %v449_v56  ;;  %1351 = vmatmul.msk.f32.vlgmr.msrb.gmra.mxu0 %vm412_vm0, %v449_v56 }
 0x131   : > { %1352 = vmatmul.msk.f32.vlgmr.msrb.gmra.mxu3 %vm412_vm0, %v449_v56  ;;  %636 = vmatpush.msra.mxu2 %v474_v3 }
 0x132   : > { %656 = vmatpush.msra.mxu3 %v478_v4  ;;  %676 = vmatpush.msra.mxu0 %v482_v5 }
 0x133   : > { %713 = vmatpush.msrb.mxu2 %v493_v6 }
 0x134   : > { %733 = vmatpush.msrb.mxu3 %v497_v7 }
 0x135   : > { %714 = vmatpush.msrb.mxu2 %v492_v9 }
 0x136   : > { %734 = vmatpush.msrb.mxu3 %v496_v10 }
 0x137   : > { %715 = vmatpush.msrb.mxu2 %v491_v11 }
 0x138   : > { %735 = vmatpush.msrb.mxu3 %v495_v12  ;;  %1353 = vmatmul.msk.f32.vlgmr.msra.gmra.mxu2 %vm412_vm0, %v449_v56 }
 0x139   : > { %1355 = vmatmul.msk.f32.vlgmr.msra.gmra.mxu0 %vm412_vm0, %v449_v56  ;;  %1354 = vmatmul.msk.f32.vlgmr.msra.gmra.mxu3 %vm412_vm0, %v449_v56 }
 0x13a   : > { %716 = vmatpush.msrb.mxu2 %v490_v13  ;;  %736 = vmatpush.msrb.mxu3 %v494_v14 }
 0x140   : > { %1357 = vmatmul.msk.f32.vlgmr.msrb.gmra.mxu2 %vm412_vm0, %v449_v56 }
 0x141   : > { %1358 = vmatmul.msk.f32.vlgmr.msrb.gmra.mxu3 %vm412_vm0, %v449_v56 }
 0x1a5   : > { %v518_v15 = vpop.f32.mrf.mxu0 }
 0x1a6   : > { %v698_v21 = vpop.f32.mrf.mxu1 }
 0x1ab   : > { %v538_v16 = vpop.f32.mrf.mxu2 }
 0x1ac   : > { %v578_v17 = vpop.f32.mrf.mxu3 }
 0x1ad   : > { %v598_v18 = vpop.f32.mrf.mxu0 }
 0x1ae   : > { %1359 = vmatpush.xpose.msk.msrb.mxu0 %vm741_vm5, %v598_v18 }
 0x1b1   : > { %1360 = vmatmul.msk.f32.vlgmr.msrb.gmra.mxu0 %vm741_vm5, %v518_v15 }
 0x1b3   : > { %v558_v19 = vpop.f32.mrf.mxu2 }
 0x1b4   : > { %v618_v20 = vpop.f32.mrf.mxu3 }
 0x1b5   : > { %1361 = vmatpush.xpose.msk.msrb.mxu1 %vm741_vm5, %v618_v20 }
 0x1b6   : > { %v678_v22 = vpop.f32.mrf.mxu0 }
 0x1b7   : > { %971 = vmatpush.msra.mxu0 %v678_v22 }
 0x1b8   : > { %1362 = vmatmul.msk.f32.vlgmr.msrb.gmra.mxu1 %vm741_vm5, %v538_v16 }
 0x1b9   : > { %994 = vmatpush.msra.mxu1 %v698_v21 }
 0x1bb   : > { %v638_v23 = vpop.f32.mrf.mxu2 }
 0x1bc   : > { %v658_v24 = vpop.f32.mrf.mxu3  ;;  %1363 = vmatpush.xpose.msk.msra.mxu2 %vm741_vm5, %v638_v23 }
 0x1bd   : > { %1365 = vmatpush.xpose.msk.msra.mxu3 %vm741_vm5, %v658_v24 }
 0x1bf   : > { %1364 = vmatmul.msk.f32.vlgmr.msra.gmra.mxu2 %vm741_vm5, %v558_v19 }
 0x1c0   : > { %1366 = vmatmul.msk.f32.vlgmr.msra.gmra.mxu3 %vm741_vm5, %v578_v17 }
 0x1c3   : > { %v718_v25 = vpop.f32.mrf.mxu2 }
 0x1c4   : > { %v738_v26 = vpop.f32.mrf.mxu3  ;;  %1017 = vmatpush.msrb.mxu2 %v718_v25 }
 0x1c5   : > { %1040 = vmatpush.msrb.mxu3 %v738_v26 }
 0x22e   : > { %v765_v30 = vpop.f32.mrf.mxu0 }
 0x22f   : > { %v853_v31 = vsel %vm850_vm6, %v765_v30, -1e+30 }
 0x230   : > { %v857_v32 = vsel %vm741_vm5, %v853_v31, -inf }
 0x231   : > { %858 = vmax.xlane.f32.xlu2 %v857_v32 }
 0x235   : > { %v791_v33 = vpop.f32.mrf.mxu1 }
 0x236   : > { %v854_v34 = vsel %vm850_vm6, %v791_v33, -1e+30 }
 0x237   : > { %v860_v35 = vsel %vm741_vm5, %v854_v34, -inf }
 0x239   : > { %861 = vmax.xlane.f32.xlu2 %v860_v35 }
 0x242   : > { %v817_v36 = vpop.f32.mrf.mxu2 }
 0x243   : > { %v855_v37 = vsel %vm850_vm6, %v817_v36, -1e+30  ;;  %v843_v39 = vpop.f32.mrf.mxu3 }
 0x244   : > { %v863_v38 = vsel %vm741_vm5, %v855_v37, -inf  ;;  %v856_v40 = vsel %vm850_vm6, %v843_v39, -1e+30 }
 0x245   : > { %864 = vmax.xlane.f32.xlu1 %v863_v38  ;;  %v866_v41 = vsel %vm741_vm5, %v856_v40, -inf }
 0x24d   : > { %867 = vmax.xlane.f32.xlu1 %v866_v41 }
 0x2a4   : > { %v859_v42 = vpop.xlane.xlu2 %858 }
 0x2a5   : > { %v869_v43 = vsub.f32 %v853_v31, %v859_v42 }
 0x2a7   : > { %v873_v44 = vmul.f32 1.442695, %v869_v43 }
 0x2a9   : > { %1434 = vpow2.f32 %v873_v44 }
 0x2ac   : > { %v862_v47 = vpop.xlane.xlu2 %861 }
 0x2ad   : > { %v870_v50 = vsub.f32 %v854_v34, %v862_v47 }
 0x2af   : > { %v1435_v45 = vpop.eup %1434  ;;  %v875_v52 = vmul.f32 1.442695, %v870_v50  ;;  %v1371_v50 = vld [vmem:[%s1981_s4 + $0x8] sm:$0xff] }
 0x2b0   : > { %v881_v46 = vsel %vm741_vm5, %v1435_v45, 0.0  ;;  %1066 = vmatpush.msrb.mxu0 %v1371_v50 }
 0x2b1   : > { %882 = vadd.xlane.f32.xlu2 %v881_v46 }
 0x2b8   : > { %v865_v48 = vpop.xlane.xlu1 %864 }
 0x2b9   : > { %v871_v49 = vsub.f32 %v855_v37, %v865_v48  ;;  %v1045_v48 = vld [vmem:[%s1981_s4] sm:$0xff] }
 0x2ba   : > { %1089 = vmatpush.msrb.mxu1 %v1045_v48 }
 0x2bb   : > { %v877_v51 = vmul.f32 1.442695, %v871_v49  ;;  %v1374_v49 = vld [vmem:[%s1981_s4 + $0x10] sm:$0xff] }
 0x2bc   : > { %1114 = vmatpush.msra.mxu2 %v1374_v49 }
 0x2bd   : > { %1436 = vpow2.f32 %v877_v51  ;;  %v1376_v51 = vld [vmem:[%s1981_s4 + $0x18] sm:$0xff] }
 0x2be   : > { %1438 = vpow2.f32 %v875_v52  ;;  %1140 = vmatpush.msra.mxu3 %v1376_v51 }
 0x2c0   : > { %v868_v53 = vpop.xlane.xlu1 %867 }
 0x2c1   : > { %v872_v54 = vsub.f32 %v856_v40, %v868_v53 }
 0x2c3   : > { %v1437_v55 = vpop.eup %1436  ;;  %v879_v56 = vmul.f32 1.442695, %v872_v54 }
 0x2c4   : > { %v887_v57 = vsel %vm741_vm5, %v1437_v55, 0.0  ;;  %v1828_v58 = vpop.eup %1438 }
 0x2c5   : > { %1440 = vpow2.f32 %v879_v56  ;;  %888 = vadd.xlane.f32.xlu0 %v887_v57  ;;  %v884_v61 = vsel %vm741_vm5, %v1828_v58, 0.0 }
 0x2cb   : > { %v1830_v59 = vpop.eup %1440 }
 0x2cc   : > { %v890_v60 = vsel %vm741_vm5, %v1830_v59, 0.0 }
 0x2cd   : > { %891 = vadd.xlane.f32.xlu1 %v890_v60  ;;  %885 = vadd.xlane.f32.xlu0 %v884_v61  ;;  %v1425_v61 = vld [vmem:[%s1982_s5] ss:$0 sm:$0xff] }
 0x324   : > { %v883_v62 = vpop.xlane.xlu2 %882 }
 0x325   : > { %1442 = vrcp.f32 %v883_v62  ;;  %v904_v3 = vand.u32 2147483648, %v883_v62  ;;  %v902_v5 = vand.u32 2147483647, %v883_v62  ;;  %vm898_vm8 = vweird.f32 %v883_v62 }
 0x327   : > { %v905_v7 = vor.u32 1.1754944e-38, %v904_v3  ;;  %vm903_vm10 = vcmp.eq.f32.partialorder %v902_v5, 8.507059e+37 }
 0x32b   : > { %v1443_v63 = vpop.eup %1442 }
 0x32c   : > { %v894_v1 = vmul.f32 %v1443_v63, %v883_v62  ;;  %vm899_vm7 = vweird.f32 %v1443_v63 }
 0x32d   : > { %vm900_vm9 = vmor %vm898_vm8, %vm899_vm7 }
 0x32e   : > { %v895_v2 = vsub.f32 1.0, %v894_v1 }
 0x330   : > { %v896_v4 = vmul.f32 %v1443_v63, %v895_v2 }
 0x332   : > { %v897_v6 = vadd.f32 %v1443_v63, %v896_v4 }
 0x334   : > { %v901_v9 = vsel %vm900_vm9, %v1443_v63, %v897_v6 }
 0x335   : > { %v906_v10 = vsel %vm903_vm10, %v905_v7, %v901_v9 }
 0x336   : > { %v907_v11 = vmul.f32 %v1435_v45, %v906_v10  ;;  %v1187_v10 = vld [vmem:[%s1985_s8 + $0x18] sm:$0xff] }
 0x338   : > { %v889_v12 = vpop.xlane.xlu0 %888  ;;  %1367 = vmatmul.msk.f32.vlgmr.msra.gmra.mxu0 %vm741_vm5, %v907_v11  ;;  %v1185_v11 = vld [vmem:[%s1985_s8 + $0x8] sm:$0xff] }
 0x339   : > { %1444 = vrcp.f32 %v889_v12  ;;  %v934_v18 = vand.u32 2147483648, %v889_v12  ;;  %v932_v20 = vand.u32 2147483647, %v889_v12  ;;  %vm928_vm12 = vweird.f32 %v889_v12  ;;  %1207 = vmatpush.msra.mxu0 %v1187_v10 }
 0x33b   : > { %v935_v23 = vor.u32 1.1754944e-38, %v934_v18  ;;  %vm933_vm14 = vcmp.eq.f32.partialorder %v932_v20, 8.507059e+37  ;;  %v1236_v18 = vld [vmem:[%s1987_s10 + $0x60] sm:$0xff] }
 0x33f   : > { %v1445_v13 = vpop.eup %1444 }
 0x340   : > { %v924_v14 = vmul.f32 %v1445_v13, %v889_v12  ;;  %v892_v15 = vpop.xlane.xlu1 %891  ;;  %v886_v16 = vpop.xlane.xlu0 %885  ;;  %vm929_vm11 = vweird.f32 %v1445_v13  ;;  %v1184_v12 = vld [vmem:[%s1985_s8] sm:$0xff] }
 0x341   : > { %1446 = vrcp.f32 %v892_v15  ;;  %vm930_vm13 = vmor %vm928_vm12, %vm929_vm11  ;;  %v949_v31 = vand.u32 2147483648, %v892_v15  ;;  %v947_v34 = vand.u32 2147483647, %v892_v15  ;;  %v919_v35 = vand.u32 2147483648, %v886_v16 }
 0x342   : > { %v925_v17 = vsub.f32 1.0, %v924_v14  ;;  %1448 = vrcp.f32 %v886_v16  ;;  %v917_v37 = vand.u32 2147483647, %v886_v16  ;;  %vm943_vm2 = vweird.f32 %v892_v15  ;;  %v1238_v14 = vld [vmem:[%s1987_s10 + $0x70] sm:$0xff] }
 0x343   : > { %v950_v39 = vor.u32 1.1754944e-38, %v949_v31  ;;  %vm913_vm4 = vweird.f32 %v886_v16  ;;  %vm948_vm6 = vcmp.eq.f32.partialorder %v947_v34, 8.507059e+37  ;;  %v920_v42 = vor.u32 1.1754944e-38, %v919_v35  ;;  %v1235_v31 = vld [vmem:[%s1987_s10 + $0x58] sm:$0xff]  ;;  %v1232_v34 = vld [vmem:[%s1987_s10 + $0x40] sm:$0xff] }
 0x344   : > { %v926_v19 = vmul.f32 %v1445_v13, %v925_v17  ;;  %vm918_vm8 = vcmp.eq.f32.partialorder %v917_v37, 8.507059e+37  ;;  %v1231_v35 = vld [vmem:[%s1987_s10 + $0x38] sm:$0xff]  ;;  %v1229_v37 = vld [vmem:[%s1987_s10 + $0x28] sm:$0xff] }
 0x346   : > { %v927_v21 = vadd.f32 %v1445_v13, %v926_v19 }
 0x347   : > { %v1447_v22 = vpop.eup %1446 }
 0x348   : > { %v1449_v24 = vpop.eup %1448  ;;  %v931_v25 = vsel %vm930_vm13, %v1445_v13, %v927_v21  ;;  %v939_v26 = vmul.f32 %v1447_v22, %v892_v15  ;;  %vm944_vm15 = vweird.f32 %v1447_v22  ;;  %v1239_v13 = vld [vmem:[%s1987_s10 + $0x78] sm:$0xff]  ;;  %v1237_v15 = vld [vmem:[%s1987_s10 + $0x68] sm:$0xff] }
 0x349   : > { %v936_v27 = vsel %vm933_vm14, %v935_v23, %v931_v25  ;;  %v909_v28 = vmul.f32 %v1449_v24, %v886_v16  ;;  %vm914_vm1 = vweird.f32 %v1449_v24  ;;  %vm945_vm3 = vmor %vm943_vm2, %vm944_vm15 }
 0x34a   : > { %v940_v29 = vsub.f32 1.0, %v939_v26  ;;  %v937_v30 = vmul.f32 %v1437_v55, %v936_v27  ;;  %vm915_vm7 = vmor %vm913_vm4, %vm914_vm1 }
 0x34b   : > { %v910_v32 = vsub.f32 1.0, %v909_v28  ;;  %v1427_v28 = vld [vmem:[%s1984_s7] ss:$0 sm:$0xff] }
 0x34c   : > { %v941_v33 = vmul.f32 %v1447_v22, %v940_v29  ;;  %1369 = vmatmul.msk.f32.vlgmr.msrb.gmra.mxu2 %vm741_vm5, %v937_v30 }
 0x34d   : > { %v911_v36 = vmul.f32 %v1449_v24, %v910_v32  ;;  %v1234_v32 = vld [vmem:[%s1987_s10 + $0x50] sm:$0xff] }
 0x34e   : > { %v942_v38 = vadd.f32 %v1447_v22, %v941_v33  ;;  %v1233_v33 = vld [vmem:[%s1987_s10 + $0x48] sm:$0xff] }
 0x34f   : > { %v912_v40 = vadd.f32 %v1449_v24, %v911_v36  ;;  %v1230_v36 = vld [vmem:[%s1987_s10 + $0x30] sm:$0xff] }
 0x350   : > { %v946_v41 = vsel %vm945_vm3, %v1447_v22, %v942_v38  ;;  %v1228_v38 = vld [vmem:[%s1987_s10 + $0x20] sm:$0xff] }
 0x351   : > { %v951_v43 = vsel %vm948_vm6, %v950_v39, %v946_v41  ;;  %v916_v44 = vsel %vm915_vm7, %v1449_v24, %v912_v40  ;;  %v1227_v39 = vld [vmem:[%s1987_s10 + $0x18] sm:$0xff]  ;;  %v1226_v40 = vld [vmem:[%s1987_s10 + $0x10] sm:$0xff]  ;;  %v1225_v41 = vld [vmem:[%s1987_s10 + $0x8] sm:$0xff] }
 0x352   : > { %v921_v45 = vsel %vm918_vm8, %v920_v42, %v916_v44  ;;  %v952_v46 = vmul.f32 %v1830_v59, %v951_v43  ;;  %v1224_v42 = vld [vmem:[%s1987_s10] sm:$0xff] }
 0x353   : > { %v922_v47 = vmul.f32 %v1828_v58, %v921_v45  ;;  %v1428_v43 = vld [vmem:[%s1986_s9] ss:$0 sm:$0xff] }
 0x354   : > { %1370 = vmatmul.msk.f32.vlgmr.msrb.gmra.mxu3 %vm741_vm5, %v952_v46 }
 0x355   : > { %1368 = vmatmul.msk.f32.vlgmr.msra.gmra.mxu1 %vm741_vm5, %v922_v47 }
 0x356   : > { %1244 = vmatpush.msra.mxu1 %v1239_v13 }
 0x358   : > { %1245 = vmatpush.msra.mxu1 %v1238_v14 }
 0x35a   : > { %1246 = vmatpush.msra.mxu1 %v1237_v15 }
 0x35c   : > { %1247 = vmatpush.msra.mxu1 %v1236_v18 }
 0x35e   : > { %1248 = vmatpush.msra.mxu1 %v1235_v31 }
 0x360   : > { %1249 = vmatpush.msra.mxu1 %v1234_v32 }
 0x362   : > { %1250 = vmatpush.msra.mxu1 %v1233_v33 }
 0x364   : > { %1251 = vmatpush.msra.mxu1 %v1232_v34 }
 0x366   : > { %1252 = vmatpush.msra.mxu1 %v1231_v35 }
 0x368   : > { %1253 = vmatpush.msra.mxu1 %v1230_v36 }
 0x36a   : > { %1254 = vmatpush.msra.mxu1 %v1229_v37 }
 0x36c   : > { %1255 = vmatpush.msra.mxu1 %v1228_v38 }
 0x36e   : > { %1256 = vmatpush.msra.mxu1 %v1227_v39 }
 0x370   : > { %1257 = vmatpush.msra.mxu1 %v1226_v40 }
 0x372   : > { %1258 = vmatpush.msra.mxu1 %v1225_v41 }
 0x374   : > { %1259 = vmatpush.msra.mxu1 %v1224_v42 }
 0x3b5   : > { %v973_v52 = vpop.f32.mrf.mxu0 }
 0x3b6   : > { %1373 = vmatmul.msk.f32.vlgmr.msrb.gmra.mxu1 %vm741_vm5, %v973_v52 }
 0x3cf   : > { %v1019_v53 = vpop.f32.mrf.mxu2 }
 0x3d0   : > { %1375 = vmatmul.msk.f32.vlgmr.msra.gmra.mxu2 %vm741_vm5, %v1019_v53 }
 0x3d2   : > { %v996_v54 = vpop.f32.mrf.mxu1 }
 0x3d3   : > { %1372 = vmatmul.msk.f32.vlgmr.msrb.gmra.mxu0 %vm741_vm5, %v996_v54 }
 0x3d7   : > { %v1042_v55 = vpop.f32.mrf.mxu3 }
 0x3d8   : > { %1377 = vmatmul.msk.f32.vlgmr.msra.gmra.mxu3 %vm741_vm5, %v1042_v55  ;;  %v1429_v55 = vld [vmem:[%s1988_s11] ss:$0 sm:$0xff] }
 0x433   : > { %v1091_v57 = vpop.f32.mrf.mxu1 }
 0x450   : > { %v1068_v56 = vpop.f32.mrf.mxu0 }
 0x451   : > { %v1092_v59 = vadd.f32 %v1091_v57, %v1068_v56 }
 0x453   : > { %v1116_v58 = vpop.f32.mrf.mxu2 }
 0x454   : > { %v1119_v60 = vadd.f32 %v1116_v58, %v1092_v59 }
 0x45b   : > { %v1142_v62 = vpop.f32.mrf.mxu3 }
 0x45c   : > { %v1145_v63 = vadd.f32 %v1142_v62, %v1119_v60 }
 0x45e   : > { %v1150_v1 = vadd.f32 %v1425_v61, %v1145_v63 }
 0x460   : > { %v1862_v2 = vadd.f32 %v1150_v1, %v1637_v0  ;;  %v1186_v0 = vld [vmem:[%s1985_s8 + $0x10] sm:$0xff] }
 0x461   : > { %1208 = vmatpush.msra.mxu0 %v1186_v0 }
 0x462   : > { %v1154_v3 = vsel %vm412_vm0, %v1862_v2, 0.0 }
 0x463   : > { %1155 = vadd.xlane.f32.xlu1 %v1154_v3  ;;  %1209 = vmatpush.msra.mxu0 %v1185_v11 }
 0x465   : > { %1210 = vmatpush.msra.mxu0 %v1184_v12 }
 0x4d6   : > { %v1156_v4 = vpop.xlane.xlu1 %1155 }
 0x4d7   : > { %v1157_v5 = vmul.f32 %v1156_v4, %v1641_v8 }
 0x4d9   : > { %v1158_v6 = vsub.f32 %v1862_v2, %v1157_v5 }
 0x4db   : > { %v1159_v7 = vmul.f32 %v1158_v6, %v1158_v6 }
 0x4dd   : > { %v1160_v9 = vsel %vm412_vm0, %v1159_v7, 0.0 }
 0x4de   : > { %1161 = vadd.xlane.f32.xlu2 %v1160_v9 }
 0x551   : > { %v1162_v16 = vpop.xlane.xlu2 %1161 }
 0x552   : > { %v1163_v17 = vmul.f32 %v1162_v16, %v1641_v8  ;;  %v1426_v8 = vld [vmem:[%s1983_s6] ss:$0 sm:$0xff] }
 0x554   : > { %v1164_v19 = vadd.f32 1e-05, %v1163_v17 }
 0x556   : > { %1450 = vrsqrt.f32 %v1164_v19  ;;  %vm1171_vm9 = vweird.f32 %v1164_v19 }
 0x55c   : > { %v1451_v20 = vpop.eup %1450 }
 0x55d   : > { %v1166_v21 = vmul.f32 %v1451_v20, %v1164_v19  ;;  %vm1172_vm5 = vweird.f32 %v1451_v20 }
 0x55e   : > { %vm1173_vm10 = vmor %vm1171_vm9, %vm1172_vm5 }
 0x55f   : > { %v1167_v22 = vmul.f32 %v1451_v20, %v1166_v21 }
 0x561   : > { %v1168_v23 = vmul.f32 0.5, %v1167_v22 }
 0x563   : > { %v1169_v24 = vsub.f32 1.5, %v1168_v23 }
 0x565   : > { %v1170_v25 = vmul.f32 %v1451_v20, %v1169_v24 }
 0x567   : > { %v1174_v26 = vsel %vm1173_vm10, %v1451_v20, %v1170_v25 }
 0x568   : > { %v1175_v27 = vmul.f32 %v1174_v26, %v1158_v6 }
 0x56a   : > { %v1179_v29 = vmul.f32 %v1426_v8, %v1175_v27 }
 0x56c   : > { %v1183_v30 = vadd.f32 %v1427_v28, %v1179_v29 }
 0x56e   : > { %1378 = vmatmul.msk.f32.vlgmr.msra.gmra.mxu0 %vm412_vm0, %v1183_v30 }
 0x5eb   : > { %v1212_v44 = vpop.f32.mrf.mxu0 }
 0x5ec   : > { %v1213_v45 = vadd.f32 %v1428_v43, %v1212_v44 }
 0x5ee   : > { %v1216_v46 = vmul.f32 0.044715, %v1213_v45  ;;  %v1215_v52 = vmul.f32 0.5, %v1213_v45 }
 0x5f0   : > { %v1217_v47 = vmul.f32 %v1216_v46, %v1213_v45 }
 0x5f2   : > { %v1218_v48 = vmul.f32 %v1217_v47, %v1213_v45 }
 0x5f4   : > { %v1219_v49 = vadd.f32 %v1218_v48, %v1213_v45 }
 0x5f6   : > { %v1220_v50 = vmul.f32 0.7978845, %v1219_v49 }
 0x5f8   : > { %1452 = vtanh.f32 %v1220_v50 }
 0x5fe   : > { %v1453_v51 = vpop.eup %1452 }
 0x5ff   : > { %v1222_v53 = vadd.f32 1.0, %v1453_v51 }
 0x601   : > { %v1223_v54 = vmul.f32 %v1222_v53, %v1215_v52 }
 0x603   : > { %1260 = vmatmul.f32.vlgmr.msra.gmra.mxu1 %v1223_v54 }
 0x680   : > { %v1261_v56 = vpop.f32.mrf.mxu1 }
 0x681   : > { %v1262_v57 = vadd.f32 %v1429_v55, %v1261_v56 }
 0x683   : > { %v1264_v58 = vadd.f32 %v1262_v57, %v1862_v2 }
 0x685   : > { %1265 = vst.msk [vmem:[%s404_s15] sm:$0xff] %vm412_vm0, %v1264_v58 }
 0x686   : > { %1481 = shalt.err (!%p1478_p3)
}
 0x687   : > { %1383 = dma.vmem_to_hbm [thread:$0]  (%p1622_p5), %s1280_s16, 128, %s1282_s1, %s1267_s25  }
 0x688 PF: > { %p1389_p4 = scmp.ge.s32.totalorder %s1516_s24, 2  ;;  %s1293_s17 = sand.u32 1, %s1504_s21  }
 0x689   : > { %s1294_s29 = scalar_lea.sflag [#allocation3], %s1293_s17 }
 0x68a   : > { %p1386_p7 = pnand %p1389_p4, %p1626_p6 }
 0x68c   : > { %p1387_p8 = pneg %p1386_p7 }
 0x68e   : > { %1499 = dma.done.wait (%p1387_p8), %s1294_s29, 128  }
 0x68f   : > { %1501 = vsyncadd (%p1387_p8), %s1294_s29, 4294967168  ;;  %p22_p9 = scmp.ge.s32.totalorder %s1609_s27, 4   ;;  %s1998_s21 = smov %s1508_s22 }
 0x690   : > { %s1999_s22 = smov %s1512_s23  ;;  %s2000_s23 = smov %s1620_s30 }
 0x691   : > { %s2001_s24 = smov %s1609_s27  ;;  %24 = sbr.rel (!%p22_p9) target bundleno = 7 (0x7), region = 106 }
 0x696   :  { %1300 = vsyncpa [#allocation3], 1 }
 0x697   :  { %1302 = vsyncpa [#allocation3 + $0x1], 1 }

</bundles_post_ra>
